<compile_context>
chip_gen: v5e
topology: v5e:2x2
jax: 0.10.0
libtpu: 0.0.40
codegen_flags: <defaults>
</compile_context>

<pallas_src>
import jax
import jax.numpy as jnp
from jax import lax
from jax.experimental import pallas as pl
from jax.experimental.pallas import tpu as pltpu

EPS = 1e-5
_LANE = 128
_TARGET_GRID_STEPS = 8          # aim for ~8 pipelined steps over the channel axis


def _round_up(x, m):
    return ((x + m - 1) // m) * m


def _vmem_budgets():
    """Hardware-derived VMEM budgets (v5e/v6e: 128 MiB, v7x: 64 MiB per core)."""
    cap = None
    try:
        cap = int(getattr(pltpu.get_tpu_info(), "vmem_capacity_bytes", 0)) or None
    except Exception:
        cap = None
    if cap is None:
        cap = 64 * 1024 * 1024                      # conservative fallback (v7x)
    data_budget = int(0.45 * cap)                   # pipeline buffers + f32 temps
    vmem_limit = min(int(0.70 * cap), 128 * 1024 * 1024)
    return data_budget, vmem_limit


def _pick_cols(n, m, itemsize, data_budget):
    """Number of 128-lane columns per stripe for the single-pass path.

    Returns None when even a single (N, 128) stripe does not fit the budget,
    in which case the large-N two-kernel path is used instead.
    """
    # Double-buffered in + out pipeline buffers plus ~3 f32 working arrays.
    bytes_per_col = n * _LANE * (4 * itemsize + 3 * 4)
    budget_cols = data_budget // max(bytes_per_col, 1)
    if budget_cols < 1:
        return None
    cols_target = max(1, -(-m // _TARGET_GRID_STEPS))   # ceil(m / 8) -> ~8 steps
    cols = int(min(budget_cols, cols_target, m))
    while m % cols:        # snap to a divisor of m -> no partial (masked) blocks
        cols -= 1
    return cols


def _bn_fused_kernel(x_ref, gamma_ref, beta_ref, o_ref):
    # Whole per-channel batch reduction lives inside this (N, TILE_D) stripe.
    x = x_ref[...].astype(jnp.float32)
    inv_n = jnp.float32(1.0 / x.shape[0])                                # mul, not div
    mean = jnp.sum(x, axis=0, keepdims=True) * inv_n                     # (1, TILE_D)
    centered = x - mean
    var = jnp.sum(centered * centered, axis=0, keepdims=True) * inv_n    # biased var
    inv_std = lax.rsqrt(var + EPS)                                       # EUP
    scale = gamma_ref[...] * inv_std                                     # (1, TILE_D)
    shift = beta_ref[...] - mean * scale
    # Re-read x_ref for the store: VMEM loads are cheap (3 vld slots/cycle) and
    # this avoids keeping x/centered/y simultaneously live in f32.
    o_ref[...] = (x_ref[...].astype(jnp.float32) * scale + shift).astype(o_ref.dtype)


def _bn_single_pass(x, gamma2d, beta2d, tile_d, vmem_limit):
    n, d_pad = x.shape
    itemsize = jnp.dtype(x.dtype).itemsize
    grid = (d_pad // tile_d,)
    return pl.pallas_call(
        _bn_fused_kernel,
        out_shape=jax.ShapeDtypeStruct((n, d_pad), x.dtype),
        grid=grid,
        in_specs=[
            pl.BlockSpec((n, tile_d), lambda j: (0, j)),
            pl.BlockSpec((1, tile_d), lambda j: (0, j)),
            pl.BlockSpec((1, tile_d), lambda j: (0, j)),
        ],
        out_specs=pl.BlockSpec((n, tile_d), lambda j: (0, j)),
        compiler_params=pltpu.CompilerParams(
            dimension_semantics=("parallel",),
            vmem_limit_bytes=vmem_limit,
        ),
        cost_estimate=pl.CostEstimate(
            flops=6 * n * d_pad,
            transcendentals=d_pad,
            bytes_accessed=2 * n * d_pad * itemsize,
        ),
    )(x, gamma2d, beta2d)


def _bn_large_n(x, gamma2d, beta2d, n_true, vmem_limit, data_budget):
    """Two-kernel path for batch sizes where a full (N, 128) stripe blows VMEM."""
    d_pad = x.shape[1]
    itemsize = jnp.dtype(x.dtype).itemsize
    tile_d = _LANE
    # Rows per stripe: double-buffered in/out plus ~3 f32 working arrays.
    bytes_per_row = tile_d * (4 * itemsize + 3 * 4)
    tile_n = (data_budget // bytes_per_row) // 8 * 8
    tile_n = int(max(8, min(tile_n, 2048)))
    n_pad = _round_up(n_true, tile_n)
    if n_pad != n_true:
        # Zero rows contribute nothing to sum / sum-of-squares; inv_n uses n_true.
        x = jnp.pad(x, ((0, n_pad - n_true), (0, 0)))
    d_steps = d_pad // tile_d
    n_steps = n_pad // tile_n
    inv_n = 1.0 / float(n_true)

    # ---- Pass 1: per-channel scale/shift via sum & sum-of-squares accumulation.
    def stats_kernel(x_ref, g_ref, b_ref, scale_ref, shift_ref, sum_ref, sq_ref):
        k = pl.program_id(1)

        @pl.when(k == 0)
        def _():
            sum_ref[...] = jnp.zeros_like(sum_ref)
            sq_ref[...] = jnp.zeros_like(sq_ref)

        xb = x_ref[...].astype(jnp.float32)
        sum_ref[...] += jnp.sum(xb, axis=0, keepdims=True)
        sq_ref[...] += jnp.sum(xb * xb, axis=0, keepdims=True)

        @pl.when(k == pl.num_programs(1) - 1)
        def _():
            mean = sum_ref[...] * inv_n
            # TODO(synk): one-pass E[x^2]-E[x]^2 variance; switch to a chunked
            # two-pass / Welford combine if cancellation at huge N ever matters.
            var = jnp.maximum(sq_ref[...] * inv_n - mean * mean, 0.0)
            scale = g_ref[...] * lax.rsqrt(var + EPS)
            scale_ref[...] = scale
            shift_ref[...] = b_ref[...] - mean * scale

    scale, shift = pl.pallas_call(
        stats_kernel,
        out_shape=(jax.ShapeDtypeStruct((1, d_pad), jnp.float32),
                   jax.ShapeDtypeStruct((1, d_pad), jnp.float32)),
        grid=(d_steps, n_steps),
        in_specs=[
            pl.BlockSpec((tile_n, tile_d), lambda j, k: (k, j)),
            pl.BlockSpec((1, tile_d), lambda j, k: (0, j)),
            pl.BlockSpec((1, tile_d), lambda j, k: (0, j)),
        ],
        out_specs=(pl.BlockSpec((1, tile_d), lambda j, k: (0, j)),
                   pl.BlockSpec((1, tile_d), lambda j, k: (0, j))),
        scratch_shapes=[pltpu.VMEM((1, tile_d), jnp.float32),
                        pltpu.VMEM((1, tile_d), jnp.float32)],
        compiler_params=pltpu.CompilerParams(
            dimension_semantics=("parallel", "arbitrary"),
            vmem_limit_bytes=vmem_limit,
        ),
        cost_estimate=pl.CostEstimate(
            flops=3 * n_pad * d_pad,
            transcendentals=d_pad,
            bytes_accessed=n_pad * d_pad * itemsize,
        ),
    )(x, gamma2d, beta2d)

    # ---- Pass 2: y = x * scale + shift  (pure elementwise, fully pipelined).
    def apply_kernel(x_ref, scale_ref, shift_ref, o_ref):
        o_ref[...] = (x_ref[...].astype(jnp.float32) * scale_ref[...]
                      + shift_ref[...]).astype(o_ref.dtype)

    out = pl.pallas_call(
        apply_kernel,
        out_shape=jax.ShapeDtypeStruct((n_pad, d_pad), x.dtype),
        grid=(d_steps, n_steps),
        in_specs=[
            pl.BlockSpec((tile_n, tile_d), lambda j, k: (k, j)),
            pl.BlockSpec((1, tile_d), lambda j, k: (0, j)),
            pl.BlockSpec((1, tile_d), lambda j, k: (0, j)),
        ],
        out_specs=pl.BlockSpec((tile_n, tile_d), lambda j, k: (k, j)),
        compiler_params=pltpu.CompilerParams(
            dimension_semantics=("parallel", "parallel"),
            vmem_limit_bytes=vmem_limit,
        ),
        cost_estimate=pl.CostEstimate(
            flops=2 * n_pad * d_pad,
            transcendentals=0,
            bytes_accessed=2 * n_pad * d_pad * itemsize,
        ),
    )(x, scale, shift)

    return out[:n_true] if n_pad != n_true else out


def linear_batch_norm(x, gamma, beta):
    """x: (N, D). gamma/beta: (D,). Training-mode BatchNorm over the batch axis."""
    n, d = x.shape
    itemsize = jnp.dtype(x.dtype).itemsize
    data_budget, vmem_limit = _vmem_budgets()

    # Pad channels to a multiple of 128 so all stores are full-lane (unmasked).
    d_pad = _round_up(d, _LANE)
    if d_pad != d:
        x_p = jnp.pad(x, ((0, 0), (0, d_pad - d)))
        gamma_p = jnp.pad(gamma.astype(jnp.float32), (0, d_pad - d),
                          constant_values=1.0)
        beta_p = jnp.pad(beta.astype(jnp.float32), (0, d_pad - d))
    else:
        x_p = x
        gamma_p = gamma.astype(jnp.float32)
        beta_p = beta.astype(jnp.float32)
    gamma2d = gamma_p.reshape(1, d_pad)
    beta2d = beta_p.reshape(1, d_pad)

    m = d_pad // _LANE
    cols = _pick_cols(n, m, itemsize, data_budget)
    if cols is not None:
        out = _bn_single_pass(x_p, gamma2d, beta2d, cols * _LANE, vmem_limit)
    else:
        out = _bn_large_n(x_p, gamma2d, beta2d, n, vmem_limit, data_budget)

    return out[:, :d] if d_pad != d else out


if __name__ == "__main__":
    # Module: LinearBatchNorm(dim=32), input x of shape (batch=8, dim=32).
    dim = 32
    batch = 8

    key = jax.random.PRNGKey(0)
    x = jax.random.normal(key, (batch, dim), dtype=jnp.float32)

    # Deterministic parameter init (nn.BatchNorm2d(dim, affine=True) defaults):
    gamma = jnp.ones((dim,), dtype=jnp.float32)   # weight
    beta = jnp.zeros((dim,), dtype=jnp.float32)   # bias

    out = linear_batch_norm(x, gamma, beta)
    out = jax.block_until_ready(out)

    # Pure-JAX reference check of the batch-norm math.
    mean = jnp.mean(x, axis=0, keepdims=True)
    var = jnp.mean((x - mean) ** 2, axis=0, keepdims=True)
    ref = (x - mean) / jnp.sqrt(var + EPS) * gamma[None, :] + beta[None, :]
    assert out.shape == x.shape and out.dtype == x.dtype
    assert jnp.allclose(out, ref, atol=1e-5, rtol=1e-5), "mismatch vs reference"

    print("KERNEL_OK")
</pallas_src>

<mosaic_0001>
module attributes {stable_mosaic.version = 11 : i64} {
  func.func @_bn_fused_kernel(%arg0: i32, %arg1: memref<8x128xf32, #tpu.memory_space<vmem>>, %arg2: memref<1x128xf32, #tpu.memory_space<vmem>>, %arg3: memref<1x128xf32, #tpu.memory_space<vmem>>, %arg4: memref<8x128xf32, #tpu.memory_space<vmem>>) attributes {dimension_semantics = [#tpu.dimension_semantics<parallel>], iteration_bounds = array<i64: 1>, scalar_prefetch = 0 : i64, scratch_operands = 0 : i64, tpu.core_type = #tpu.core_type<tc>, window_params = [{transform_indices = @transform_0, window_bounds = array<i64: 8, 128>}, {transform_indices = @transform_1, window_bounds = array<i64: 1, 128>}, {transform_indices = @transform_2, window_bounds = array<i64: 1, 128>}, {transform_indices = @transform_3, window_bounds = array<i64: 8, 128>}]} {
    %c0 = arith.constant 0 : index
    %c0_0 = arith.constant 0 : index
    %0 = vector.load %arg1[%c0, %c0_0] : memref<8x128xf32, #tpu.memory_space<vmem>>, vector<8x128xf32>
    %cst = arith.constant dense<0.000000e+00> : vector<128xf32>
    %1 = vector.multi_reduction <add>, %0, %cst [0] : vector<8x128xf32> to vector<128xf32>
    %2 = vector.shape_cast %1 : vector<128xf32> to vector<1x128xf32>
    %cst_1 = arith.constant 1.250000e-01 : f32
    %3 = vector.broadcast %cst_1 : f32 to vector<1x128xf32>
    %4 = arith.mulf %2, %3 : vector<1x128xf32>
    %5 = vector.broadcast %4 : vector<1x128xf32> to vector<8x128xf32>
    %6 = arith.subf %0, %5 : vector<8x128xf32>
    %7 = arith.mulf %6, %6 : vector<8x128xf32>
    %cst_2 = arith.constant dense<0.000000e+00> : vector<128xf32>
    %8 = vector.multi_reduction <add>, %7, %cst_2 [0] : vector<8x128xf32> to vector<128xf32>
    %9 = vector.shape_cast %8 : vector<128xf32> to vector<1x128xf32>
    %cst_3 = arith.constant 1.250000e-01 : f32
    %10 = vector.broadcast %cst_3 : f32 to vector<1x128xf32>
    %11 = arith.mulf %9, %10 : vector<1x128xf32>
    %cst_4 = arith.constant 9.99999974E-6 : f32
    %12 = vector.broadcast %cst_4 : f32 to vector<1x128xf32>
    %13 = arith.addf %11, %12 : vector<1x128xf32>
    %14 = math.rsqrt %13 : vector<1x128xf32>
    %c0_5 = arith.constant 0 : index
    %c0_6 = arith.constant 0 : index
    %15 = vector.load %arg2[%c0_5, %c0_6] : memref<1x128xf32, #tpu.memory_space<vmem>>, vector<1x128xf32>
    %16 = arith.mulf %15, %14 : vector<1x128xf32>
    %c0_7 = arith.constant 0 : index
    %c0_8 = arith.constant 0 : index
    %17 = vector.load %arg3[%c0_7, %c0_8] : memref<1x128xf32, #tpu.memory_space<vmem>>, vector<1x128xf32>
    %18 = arith.mulf %4, %16 : vector<1x128xf32>
    %19 = arith.subf %17, %18 : vector<1x128xf32>
    %c0_9 = arith.constant 0 : index
    %c0_10 = arith.constant 0 : index
    %20 = vector.load %arg1[%c0_9, %c0_10] : memref<8x128xf32, #tpu.memory_space<vmem>>, vector<8x128xf32>
    %21 = vector.broadcast %16 : vector<1x128xf32> to vector<8x128xf32>
    %22 = arith.mulf %20, %21 : vector<8x128xf32>
    %23 = vector.broadcast %19 : vector<1x128xf32> to vector<8x128xf32>
    %24 = arith.addf %22, %23 : vector<8x128xf32>
    %c0_11 = arith.constant 0 : index
    %c0_12 = arith.constant 0 : index
    %25 = vector.load %arg4[%c0_11, %c0_12] : memref<8x128xf32, #tpu.memory_space<vmem>>, vector<8x128xf32>
    tpu.vector_store %arg4[%c0_11, %c0_12], %24 {strides = array<i32>} : memref<8x128xf32, #tpu.memory_space<vmem>>, vector<8x128xf32>,
    return
  }
  func.func @transform_0(%arg0: i32) -> (i32, i32) {
    %c0_i32 = arith.constant 0 : i32
    %c0_i32_0 = arith.constant 0 : i32
    return %c0_i32, %arg0 : i32, i32
  }
  func.func @transform_1(%arg0: i32) -> (i32, i32) {
    %c0_i32 = arith.constant 0 : i32
    %c0_i32_0 = arith.constant 0 : i32
    return %c0_i32, %arg0 : i32, i32
  }
  func.func @transform_2(%arg0: i32) -> (i32, i32) {
    %c0_i32 = arith.constant 0 : i32
    %c0_i32_0 = arith.constant 0 : i32
    return %c0_i32, %arg0 : i32, i32
  }
  func.func @transform_3(%arg0: i32) -> (i32, i32) {
    %c0_i32 = arith.constant 0 : i32
    %c0_i32_0 = arith.constant 0 : i32
    return %c0_i32, %arg0 : i32, i32
  }
}

</mosaic_0001>

<bundles_post_ra>
// kernel: tpu_custom_call.1
= control target key start
LH: loop header
LB: loop body
LE: loop exit
PB: predicated region body
PF: predicated region fallthrough
CT: control target
= control target key end

     0   :  { %8 = vsyncpa [#allocation3], 0  ;;  %s221_s0 = inlined_call_operand.hbm [shape: f32[8,128], index: 0, kind: input, shape index: {}]   ;;  %s222_s1 = inlined_call_operand.hbm [shape: f32[1,128], index: 1, kind: input, shape index: {}]   ;;  %s223_s2 = inlined_call_operand.vmem [shape: f32[1,128], index: 2, kind: input, shape index: {}]   ;;  %s224_s3 = inlined_call_operand.hbm [shape: f32[8,128], index: 3, kind: output, shape index: {}]  }
   0x1   :  { %9 = vsyncpa [#allocation6], 0 }
   0x2   :  { %10 = vsyncpa [#allocation4], 0  ;;  %s16_s14 = sshll.u32 %s221_s0, 4  ;;  %s186_s15 = smov [#allocation2]   ;;  %s17_s14 = int_to_ptr.hbm [resolvable:$true] %s16_s14 }
   0x3   :  { %s18_s16 = sshll.u32 %s186_s15, 4  ;;  %s27_s19 = sshll.u32 %s222_s1, 4  ;;  %s19_s16 = int_to_ptr.vmem [resolvable:$true] %s18_s16  ;;  %s28_s19 = int_to_ptr.hbm [resolvable:$true] %s27_s19 }
   0x4   :  { %21 = dma.hbm_to_vmem [thread:$0]  %s17_s14, 128, %s19_s16, [#allocation3]  }
   0x5   :  { %s187_s20 = smov [#allocation5]  }
   0x6   :  { %s29_s21 = sshll.u32 %s187_s20, 4  ;;  %s30_s21 = int_to_ptr.vmem [resolvable:$true] %s29_s21 }
   0x7   :  { %32 = dma.hbm_to_vmem [thread:$0]  %s28_s19, 16, %s30_s21, [#allocation6]  }
   0x8   :  { %180 = dma.done.wait [#allocation3], 128  }
   0x9   :  { %181 = vsyncadd [#allocation3], 4294967168 }
   0xa   :  { %182 = dma.done.wait [#allocation6], 16  }
   0xb   :  { %183 = vsyncadd [#allocation6], 4294967280  ;;  %v43_v0 = vld [vmem:[#allocation2] sm:$0xff]  ;;  %v71_v24 = vld [vmem:[#allocation5] sm:$0x1]  ;;  %s188_s22 = smov [#allocation7]  }
   0xc   :  { %v44_v1 = vrot.slane %v43_v0, 4  ;;  %v73_v27 = vld [vmem:[%s223_s2] sm:$0x1]  ;;  %s90_s23 = sshll.u32 %s188_s22, 4  ;;  %s92_s26 = sshll.u32 %s224_s3, 4  ;;  %s91_s23 = int_to_ptr.vmem [resolvable:$true] %s90_s23  ;;  %s93_s26 = int_to_ptr.hbm [resolvable:$true] %s92_s26 }
   0xe   :  { %v45_v2 = vadd.f32 %v44_v1, %v43_v0 }
  0x10   :  { %v46_v3 = vrot.slane %v45_v2, 2 }
  0x12   :  { %v47_v4 = vadd.f32 %v46_v3, %v45_v2 }
  0x14   :  { %v48_v5 = vrot.slane %v47_v4, 1 }
  0x16   :  { %v49_v6 = vadd.f32 %v48_v5, %v47_v4 }
  0x18   :  { %v50_v7 = vmul.f32 0.125, %v49_v6 }
  0x1a   :  { %v51_v8 = vsub.f32 %v43_v0, %v50_v7 }
  0x1c   :  { %v52_v9 = vmul.f32 %v51_v8, %v51_v8 }
  0x1e   :  { %v53_v10 = vrot.slane %v52_v9, 4 }
  0x20   :  { %v54_v11 = vadd.f32 %v53_v10, %v52_v9 }
  0x22   :  { %v55_v12 = vrot.slane %v54_v11, 2 }
  0x24   :  { %v56_v13 = vadd.f32 %v55_v12, %v54_v11 }
  0x26   :  { %v57_v14 = vrot.slane %v56_v13, 1 }
  0x28   :  { %v58_v15 = vadd.f32 %v57_v14, %v56_v13 }
  0x2a   :  { %v59_v16 = vmul.f32 0.125, %v58_v15 }
  0x2c   :  { %v60_v17 = vadd.f32 1e-05, %v59_v16 }
  0x2e   :  { %106 = vrsqrt.f32 %v60_v17  ;;  %vm67_vm0 = vweird.f32 %v60_v17 }
  0x34   :  { %v107_v18 = vpop.eup %106 }
  0x35   :  { %v62_v19 = vmul.f32 %v107_v18, %v60_v17  ;;  %vm68_vm1 = vweird.f32 %v107_v18 }
  0x36   :  { %vm69_vm2 = vmor %vm67_vm0, %vm68_vm1 }
  0x37   :  { %v63_v20 = vmul.f32 %v107_v18, %v62_v19 }
  0x39   :  { %v64_v21 = vmul.f32 0.5, %v63_v20 }
  0x3b   :  { %v65_v22 = vsub.f32 1.5, %v64_v21 }
  0x3d   :  { %v66_v23 = vmul.f32 %v107_v18, %v65_v22 }
  0x3f   :  { %v70_v25 = vsel %vm69_vm2, %v107_v18, %v66_v23 }
  0x40   :  { %v72_v26 = vmul.f32 %v71_v24, %v70_v25 }
  0x42   :  { %v74_v28 = vmul.f32 %v72_v26, %v50_v7  ;;  %v77_v29 = vperm.slane %v72_v26, 0 }
  0x44   :  { %v75_v30 = vsub.f32 %v73_v27, %v74_v28  ;;  %v79_v31 = vmul.f32 %v77_v29, %v43_v0 }
  0x46   :  { %v81_v32 = vperm.slane %v75_v30, 0 }
  0x48   :  { %v83_v33 = vadd.f32 %v81_v32, %v79_v31 }
  0x4a   :  { %84 = vst [vmem:[#allocation7] sm:$0xff] %v83_v33 }
  0x4b   :  { %95 = dma.vmem_to_hbm [thread:$0]  %s91_s23, 128, %s93_s26, [#allocation4]  }
  0x4c   :  { %184 = dma.done.wait [#allocation4], 128  }
  0x4d   :  { %185 = vsyncadd [#allocation4], 4294967168 }
  0x4e   :  { %100 = vsyncpa [#allocation3], 1 }
  0x4f   :  { %101 = vsyncpa [#allocation6], 1 }
  0x50   :  { %102 = vsyncpa [#allocation4], 1 }

</bundles_post_ra>
